<compile_context>
chip_gen: v5e
topology: v5e:2x2
jax: 0.10.0
libtpu: 0.0.40
codegen_flags: <defaults>
</compile_context>

<pallas_src>
import jax
import jax.numpy as jnp
from jax import lax
from jax.experimental import pallas as pl
from jax.experimental.pallas import tpu as pltpu


def _block_kernel(x_ref, w1_ref, sh1_ref, w2_ref, sh2_ref, out_ref, xbuf, y1buf):
    """Fused ResNet block for one batch element.

    x_ref   : (H, W*C)      input in lane-packed layout (also the residual branch)
    w1_ref  : (3, W*C, W*C) conv1 banded weights, BN1 scale folded in (bf16)
    sh1_ref : (1, W*C)      BN1 shift, tiled over W (f32)
    w2_ref  : (3, W*C, W*C) conv2 banded weights, BN2 scale folded in (bf16)
    sh2_ref : (1, W*C)      BN2 shift, tiled over W (f32)
    out_ref : (H, W*C)
    xbuf    : VMEM scratch (H+2, W*C) f32 — row-padded x
    y1buf   : VMEM scratch (H+2, W*C) f32 — row-padded ReLU(conv1) intermediate
    """
    H, WC = out_ref.shape
    zrow = jnp.zeros((1, WC), jnp.float32)

    def conv3x3(buf_ref, w_ref):
        # 3 row-tap matmuls; kw taps + width padding + BN scale are folded into w_ref.
        acc = None
        for kh in range(3):
            part = jnp.dot(buf_ref[kh:kh + H, :].astype(jnp.bfloat16), w_ref[kh],
                           preferred_element_type=jnp.float32)
            acc = part if acc is None else acc + part
        return acc

    # ---- conv1 (+ folded BN1) + ReLU.  Dropout(p=0.1) is identity in eval mode. ----
    # Only the two halo rows are (re)zeroed; the interior is fully overwritten each step.
    xbuf[0:1, :] = zrow
    xbuf[H + 1:H + 2, :] = zrow
    xbuf[1:H + 1, :] = x_ref[...]
    y1 = jnp.maximum(conv3x3(xbuf, w1_ref) + sh1_ref[...], 0.0)

    # ---- conv2 (+ folded BN2) ----
    y1buf[0:1, :] = zrow
    y1buf[H + 1:H + 2, :] = zrow
    y1buf[1:H + 1, :] = y1
    y2 = conv3x3(y1buf, w2_ref) + sh2_ref[...]

    # ---- residual add (identity == x: stride=1, no downsample) + ReLU ----
    out_ref[...] = jnp.maximum(y2 + x_ref[...], 0.0).astype(out_ref.dtype)


def _fold_bn(conv_bias, gamma, beta, mean, var, eps=1e-5):
    scale = gamma / jnp.sqrt(var + eps)
    shift = beta + scale * (conv_bias - mean)
    return scale.astype(jnp.float32), shift.astype(jnp.float32)


def _band_weights(w_hwio, scale, W):
    """Fold the BN scale into the conv weights and pack the kw taps + width padding into
    3 banded matrices:  Wb[kh][wp*Cin + ci, wo*Cout + co] = scale[co]*w[kh, wp-wo+1, ci, co]
    (zero where |wp - wo| > 1, which also encodes the width zero-padding)."""
    _, _, Cin, Cout = w_hwio.shape
    wf = (w_hwio * scale.reshape(1, 1, 1, Cout)).astype(jnp.float32)     # (3,3,Cin,Cout)
    kw = jnp.arange(3)
    wp = jnp.arange(W)
    wo = jnp.arange(W)
    sel = (wp[None, :, None] == wo[None, None, :] + kw[:, None, None] - 1)
    sel = sel.astype(jnp.float32)                                        # (3, W, W)
    band = (sel[None, :, :, None, :, None] * wf[:, :, None, :, None, :]).sum(axis=1)
    return band.reshape(3, W * Cin, W * Cout).astype(jnp.bfloat16)


def resnet_block_forward(x_nchw, params):
    """Forward of the PyTorch `Block` (stride=1, no identity_downsample), eval mode."""
    N, Cin, H, W = x_nchw.shape
    Cout = params["w1"].shape[-1]
    assert Cin == Cout, "no identity_downsample: in_channels must equal out_channels"
    WC = W * Cout

    # NCHW -> lane-packed (N, H, W*C); channels stay fastest within each lane group.
    x = jnp.transpose(x_nchw, (0, 2, 3, 1)).reshape(N, H, W * Cin)

    s1, b1 = _fold_bn(params["b1"], params["gamma1"], params["beta1"],
                      params["mean1"], params["var1"])
    s2, b2 = _fold_bn(params["b2"], params["gamma2"], params["beta2"],
                      params["mean2"], params["var2"])
    w1b = _band_weights(params["w1"], s1, W)          # (3, W*Cin, W*Cout) bf16
    w2b = _band_weights(params["w2"], s2, W)
    sh1 = jnp.tile(b1, W).reshape(1, WC)              # per-channel shift tiled over W
    sh2 = jnp.tile(b2, W).reshape(1, WC)

    out = pl.pallas_call(
        _block_kernel,
        out_shape=jax.ShapeDtypeStruct((N, H, WC), x.dtype),
        grid_spec=pltpu.PrefetchScalarGridSpec(
            num_scalar_prefetch=0,
            grid=(N,),
            in_specs=[
                pl.BlockSpec((None, H, WC), lambda n: (n, 0, 0)),   # x (also residual)
                pl.BlockSpec((3, WC, WC), lambda n: (0, 0, 0)),     # conv1 banded weights
                pl.BlockSpec((1, WC), lambda n: (0, 0)),            # BN1 shift
                pl.BlockSpec((3, WC, WC), lambda n: (0, 0, 0)),     # conv2 banded weights
                pl.BlockSpec((1, WC), lambda n: (0, 0)),            # BN2 shift
            ],
            out_specs=pl.BlockSpec((None, H, WC), lambda n: (n, 0, 0)),
            scratch_shapes=[pltpu.VMEM((H + 2, WC), jnp.float32),   # row-padded x
                            pltpu.VMEM((H + 2, WC), jnp.float32)],  # row-padded relu(conv1)
        ),
        compiler_params=pltpu.CompilerParams(
            dimension_semantics=("parallel",)),
    )(x, w1b, sh1, w2b, sh2)

    return jnp.transpose(out.reshape(N, H, W, Cout), (0, 3, 1, 2))  # -> NCHW


def _reference_forward(x_nchw, params, eps=1e-5):
    """Pure-JAX reference (eval mode).  Conv operands are rounded to bf16 to mirror the
    kernel's bf16 MXU inputs; accumulation, BN shift and the residual add stay in f32."""
    x = jnp.transpose(x_nchw, (0, 2, 3, 1))
    dn = ("NHWC", "HWIO", "NHWC")

    def q(a):  # bf16 quantization of conv operands
        return a.astype(jnp.bfloat16).astype(jnp.float32)

    def conv_bn(inp, w, b, g, be, m, v):
        scale = g / jnp.sqrt(v + eps)
        shift = be + scale * (b - m)
        y = lax.conv_general_dilated(q(inp), q(w * scale.reshape(1, 1, 1, -1)),
                                     (1, 1), "SAME", dimension_numbers=dn,
                                     precision=lax.Precision.HIGHEST)
        return y + shift.reshape(1, 1, 1, -1)

    y = conv_bn(x, params["w1"], params["b1"], params["gamma1"], params["beta1"],
                params["mean1"], params["var1"])
    y = jnp.maximum(y, 0.0)                           # ReLU; Dropout(p=0.1) identity in eval
    y = conv_bn(y, params["w2"], params["b2"], params["gamma2"], params["beta2"],
                params["mean2"], params["var2"])
    y = jnp.maximum(y + x, 0.0)
    return jnp.transpose(y, (0, 3, 1, 2))


def _init_params(key, c_in, c_out):
    ks = jax.random.split(key, 6)
    return {
        "w1": (0.1 * jax.random.normal(ks[0], (3, 3, c_in, c_out))).astype(jnp.float32),
        "b1": (0.05 * jax.random.normal(ks[1], (c_out,))).astype(jnp.float32),
        "gamma1": jnp.ones((c_out,), jnp.float32),
        "beta1": jnp.zeros((c_out,), jnp.float32),
        "mean1": (0.01 * jax.random.normal(ks[2], (c_out,))).astype(jnp.float32),
        "var1": jnp.ones((c_out,), jnp.float32) * 0.9,
        "w2": (0.1 * jax.random.normal(ks[3], (3, 3, c_out, c_out))).astype(jnp.float32),
        "b2": (0.05 * jax.random.normal(ks[4], (c_out,))).astype(jnp.float32),
        "gamma2": jnp.ones((c_out,), jnp.float32),
        "beta2": jnp.zeros((c_out,), jnp.float32),
        "mean2": (0.01 * jax.random.normal(ks[5], (c_out,))).astype(jnp.float32),
        "var2": jnp.ones((c_out,), jnp.float32) * 1.1,
    }


if __name__ == "__main__":
    key = jax.random.PRNGKey(0)
    k_x, k_p = jax.random.split(key)

    N, C, H, W = 2, 8, 16, 16        # NCHW; in_channels == out_channels, W*C = 128 lanes
    x = jax.random.normal(k_x, (N, C, H, W), dtype=jnp.float32)
    params = _init_params(k_p, C, C)

    out = jax.block_until_ready(resnet_block_forward(x, params))
    ref = _reference_forward(x, params)

    assert out.shape == (N, C, H, W)
    assert jnp.allclose(out, ref, atol=5e-3, rtol=5e-3), \
        f"max abs err {jnp.max(jnp.abs(out - ref))}"

    print("KERNEL_OK")
</pallas_src>

<mosaic_0001>
module attributes {stable_mosaic.version = 11 : i64} {
  func.func @_block_kernel(%arg0: i32, %arg1: memref<1x16x128xf32, #tpu.memory_space<vmem>>, %arg2: memref<3x128x128xbf16, #tpu.memory_space<vmem>>, %arg3: memref<1x128xf32, #tpu.memory_space<vmem>>, %arg4: memref<3x128x128xbf16, #tpu.memory_space<vmem>>, %arg5: memref<1x128xf32, #tpu.memory_space<vmem>>, %arg6: memref<1x16x128xf32, #tpu.memory_space<vmem>>, %arg7: memref<18x128xf32, #tpu.memory_space<vmem>>, %arg8: memref<18x128xf32, #tpu.memory_space<vmem>>) attributes {dimension_semantics = [#tpu.dimension_semantics<parallel>], iteration_bounds = array<i64: 2>, scalar_prefetch = 0 : i64, scratch_operands = 2 : i64, tpu.core_type = #tpu.core_type<tc>, window_params = [{transform_indices = @transform_0, window_bounds = array<i64: 1, 16, 128>}, {pipeline_mode = #tpu.pipeline_mode<synchronous>, transform_indices = @transform_1, window_bounds = array<i64: 3, 128, 128>}, {pipeline_mode = #tpu.pipeline_mode<synchronous>, transform_indices = @transform_2, window_bounds = array<i64: 1, 128>}, {pipeline_mode = #tpu.pipeline_mode<synchronous>, transform_indices = @transform_3, window_bounds = array<i64: 3, 128, 128>}, {pipeline_mode = #tpu.pipeline_mode<synchronous>, transform_indices = @transform_4, window_bounds = array<i64: 1, 128>}, {transform_indices = @transform_5, window_bounds = array<i64: 1, 16, 128>}]} {
    %cst = arith.constant 0.000000e+00 : f32
    %0 = vector.broadcast %cst : f32 to vector<1x128xf32>
    %c0 = arith.constant 0 : index
    %c0_0 = arith.constant 0 : index
    %1 = vector.load %arg7[%c0, %c0_0] : memref<18x128xf32, #tpu.memory_space<vmem>>, vector<1x128xf32>
    tpu.vector_store %arg7[%c0, %c0_0], %0 {strides = array<i32>} : memref<18x128xf32, #tpu.memory_space<vmem>>, vector<1x128xf32>,
    %c17 = arith.constant 17 : index
    %c0_1 = arith.constant 0 : index
    %2 = vector.load %arg7[%c17, %c0_1] : memref<18x128xf32, #tpu.memory_space<vmem>>, vector<1x128xf32>
    tpu.vector_store %arg7[%c17, %c0_1], %0 {strides = array<i32>} : memref<18x128xf32, #tpu.memory_space<vmem>>, vector<1x128xf32>,
    %c0_2 = arith.constant 0 : index
    %c0_3 = arith.constant 0 : index
    %c0_4 = arith.constant 0 : index
    %3 = vector.load %arg1[%c0_2, %c0_3, %c0_4] : memref<1x16x128xf32, #tpu.memory_space<vmem>>, vector<1x16x128xf32>
    %4 = vector.shape_cast %3 : vector<1x16x128xf32> to vector<16x128xf32>
    %c1 = arith.constant 1 : index
    %c0_5 = arith.constant 0 : index
    %5 = vector.load %arg7[%c1, %c0_5] : memref<18x128xf32, #tpu.memory_space<vmem>>, vector<16x128xf32>
    tpu.vector_store %arg7[%c1, %c0_5], %4 {strides = array<i32>} : memref<18x128xf32, #tpu.memory_space<vmem>>, vector<16x128xf32>,
    %c0_6 = arith.constant 0 : index
    %c0_7 = arith.constant 0 : index
    %6 = vector.load %arg7[%c0_6, %c0_7] : memref<18x128xf32, #tpu.memory_space<vmem>>, vector<16x128xf32>
    %7 = arith.truncf %6 : vector<16x128xf32> to vector<16x128xbf16>
    %c0_8 = arith.constant 0 : index
    %c0_9 = arith.constant 0 : index
    %c0_10 = arith.constant 0 : index
    %8 = vector.load %arg2[%c0_8, %c0_9, %c0_10] : memref<3x128x128xbf16, #tpu.memory_space<vmem>>, vector<1x128x128xbf16>
    %9 = vector.shape_cast %8 : vector<1x128x128xbf16> to vector<128x128xbf16>
    %cst_11 = arith.constant dense<0.000000e+00> : vector<16x128xf32>
    %10 = tpu.matmul %7, %9, %cst_11 {dimension_numbers = #tpu.dot_dimension_numbers<[1], [0], [0], [1], [0, 0, 1, 1], [], []>} : vector<16x128xbf16>, vector<128x128xbf16>, vector<16x128xf32> -> vector<16x128xf32>
    %c1_12 = arith.constant 1 : index
    %c0_13 = arith.constant 0 : index
    %11 = vector.load %arg7[%c1_12, %c0_13] : memref<18x128xf32, #tpu.memory_space<vmem>>, vector<16x128xf32>
    %12 = arith.truncf %11 : vector<16x128xf32> to vector<16x128xbf16>
    %c1_14 = arith.constant 1 : index
    %c0_15 = arith.constant 0 : index
    %c0_16 = arith.constant 0 : index
    %13 = vector.load %arg2[%c1_14, %c0_15, %c0_16] : memref<3x128x128xbf16, #tpu.memory_space<vmem>>, vector<1x128x128xbf16>
    %14 = vector.shape_cast %13 : vector<1x128x128xbf16> to vector<128x128xbf16>
    %cst_17 = arith.constant dense<0.000000e+00> : vector<16x128xf32>
    %15 = tpu.matmul %12, %14, %cst_17 {dimension_numbers = #tpu.dot_dimension_numbers<[1], [0], [0], [1], [0, 0, 1, 1], [], []>} : vector<16x128xbf16>, vector<128x128xbf16>, vector<16x128xf32> -> vector<16x128xf32>
    %16 = arith.addf %10, %15 : vector<16x128xf32>
    %c2 = arith.constant 2 : index
    %c0_18 = arith.constant 0 : index
    %17 = vector.load %arg7[%c2, %c0_18] : memref<18x128xf32, #tpu.memory_space<vmem>>, vector<16x128xf32>
    %18 = arith.truncf %17 : vector<16x128xf32> to vector<16x128xbf16>
    %c2_19 = arith.constant 2 : index
    %c0_20 = arith.constant 0 : index
    %c0_21 = arith.constant 0 : index
    %19 = vector.load %arg2[%c2_19, %c0_20, %c0_21] : memref<3x128x128xbf16, #tpu.memory_space<vmem>>, vector<1x128x128xbf16>
    %20 = vector.shape_cast %19 : vector<1x128x128xbf16> to vector<128x128xbf16>
    %cst_22 = arith.constant dense<0.000000e+00> : vector<16x128xf32>
    %21 = tpu.matmul %18, %20, %cst_22 {dimension_numbers = #tpu.dot_dimension_numbers<[1], [0], [0], [1], [0, 0, 1, 1], [], []>} : vector<16x128xbf16>, vector<128x128xbf16>, vector<16x128xf32> -> vector<16x128xf32>
    %22 = arith.addf %16, %21 : vector<16x128xf32>
    %c0_23 = arith.constant 0 : index
    %c0_24 = arith.constant 0 : index
    %23 = vector.load %arg3[%c0_23, %c0_24] : memref<1x128xf32, #tpu.memory_space<vmem>>, vector<1x128xf32>
    %24 = vector.broadcast %23 : vector<1x128xf32> to vector<16x128xf32>
    %25 = arith.addf %22, %24 : vector<16x128xf32>
    %cst_25 = arith.constant 0.000000e+00 : f32
    %26 = vector.broadcast %cst_25 : f32 to vector<16x128xf32>
    %27 = arith.maximumf %25, %26 : vector<16x128xf32>
    %c0_26 = arith.constant 0 : index
    %c0_27 = arith.constant 0 : index
    %28 = vector.load %arg8[%c0_26, %c0_27] : memref<18x128xf32, #tpu.memory_space<vmem>>, vector<1x128xf32>
    tpu.vector_store %arg8[%c0_26, %c0_27], %0 {strides = array<i32>} : memref<18x128xf32, #tpu.memory_space<vmem>>, vector<1x128xf32>,
    %c17_28 = arith.constant 17 : index
    %c0_29 = arith.constant 0 : index
    %29 = vector.load %arg8[%c17_28, %c0_29] : memref<18x128xf32, #tpu.memory_space<vmem>>, vector<1x128xf32>
    tpu.vector_store %arg8[%c17_28, %c0_29], %0 {strides = array<i32>} : memref<18x128xf32, #tpu.memory_space<vmem>>, vector<1x128xf32>,
    %c1_30 = arith.constant 1 : index
    %c0_31 = arith.constant 0 : index
    %30 = vector.load %arg8[%c1_30, %c0_31] : memref<18x128xf32, #tpu.memory_space<vmem>>, vector<16x128xf32>
    tpu.vector_store %arg8[%c1_30, %c0_31], %27 {strides = array<i32>} : memref<18x128xf32, #tpu.memory_space<vmem>>, vector<16x128xf32>,
    %c0_32 = arith.constant 0 : index
    %c0_33 = arith.constant 0 : index
    %31 = vector.load %arg8[%c0_32, %c0_33] : memref<18x128xf32, #tpu.memory_space<vmem>>, vector<16x128xf32>
    %32 = arith.truncf %31 : vector<16x128xf32> to vector<16x128xbf16>
    %c0_34 = arith.constant 0 : index
    %c0_35 = arith.constant 0 : index
    %c0_36 = arith.constant 0 : index
    %33 = vector.load %arg4[%c0_34, %c0_35, %c0_36] : memref<3x128x128xbf16, #tpu.memory_space<vmem>>, vector<1x128x128xbf16>
    %34 = vector.shape_cast %33 : vector<1x128x128xbf16> to vector<128x128xbf16>
    %cst_37 = arith.constant dense<0.000000e+00> : vector<16x128xf32>
    %35 = tpu.matmul %32, %34, %cst_37 {dimension_numbers = #tpu.dot_dimension_numbers<[1], [0], [0], [1], [0, 0, 1, 1], [], []>} : vector<16x128xbf16>, vector<128x128xbf16>, vector<16x128xf32> -> vector<16x128xf32>
    %c1_38 = arith.constant 1 : index
    %c0_39 = arith.constant 0 : index
    %36 = vector.load %arg8[%c1_38, %c0_39] : memref<18x128xf32, #tpu.memory_space<vmem>>, vector<16x128xf32>
    %37 = arith.truncf %36 : vector<16x128xf32> to vector<16x128xbf16>
    %c1_40 = arith.constant 1 : index
    %c0_41 = arith.constant 0 : index
    %c0_42 = arith.constant 0 : index
    %38 = vector.load %arg4[%c1_40, %c0_41, %c0_42] : memref<3x128x128xbf16, #tpu.memory_space<vmem>>, vector<1x128x128xbf16>
    %39 = vector.shape_cast %38 : vector<1x128x128xbf16> to vector<128x128xbf16>
    %cst_43 = arith.constant dense<0.000000e+00> : vector<16x128xf32>
    %40 = tpu.matmul %37, %39, %cst_43 {dimension_numbers = #tpu.dot_dimension_numbers<[1], [0], [0], [1], [0, 0, 1, 1], [], []>} : vector<16x128xbf16>, vector<128x128xbf16>, vector<16x128xf32> -> vector<16x128xf32>
    %41 = arith.addf %35, %40 : vector<16x128xf32>
    %c2_44 = arith.constant 2 : index
    %c0_45 = arith.constant 0 : index
    %42 = vector.load %arg8[%c2_44, %c0_45] : memref<18x128xf32, #tpu.memory_space<vmem>>, vector<16x128xf32>
    %43 = arith.truncf %42 : vector<16x128xf32> to vector<16x128xbf16>
    %c2_46 = arith.constant 2 : index
    %c0_47 = arith.constant 0 : index
    %c0_48 = arith.constant 0 : index
    %44 = vector.load %arg4[%c2_46, %c0_47, %c0_48] : memref<3x128x128xbf16, #tpu.memory_space<vmem>>, vector<1x128x128xbf16>
    %45 = vector.shape_cast %44 : vector<1x128x128xbf16> to vector<128x128xbf16>
    %cst_49 = arith.constant dense<0.000000e+00> : vector<16x128xf32>
    %46 = tpu.matmul %43, %45, %cst_49 {dimension_numbers = #tpu.dot_dimension_numbers<[1], [0], [0], [1], [0, 0, 1, 1], [], []>} : vector<16x128xbf16>, vector<128x128xbf16>, vector<16x128xf32> -> vector<16x128xf32>
    %47 = arith.addf %41, %46 : vector<16x128xf32>
    %c0_50 = arith.constant 0 : index
    %c0_51 = arith.constant 0 : index
    %48 = vector.load %arg5[%c0_50, %c0_51] : memref<1x128xf32, #tpu.memory_space<vmem>>, vector<1x128xf32>
    %49 = vector.broadcast %48 : vector<1x128xf32> to vector<16x128xf32>
    %50 = arith.addf %47, %49 : vector<16x128xf32>
    %c0_52 = arith.constant 0 : index
    %c0_53 = arith.constant 0 : index
    %c0_54 = arith.constant 0 : index
    %51 = vector.load %arg1[%c0_52, %c0_53, %c0_54] : memref<1x16x128xf32, #tpu.memory_space<vmem>>, vector<1x16x128xf32>
    %52 = vector.shape_cast %51 : vector<1x16x128xf32> to vector<16x128xf32>
    %53 = arith.addf %50, %52 : vector<16x128xf32>
    %cst_55 = arith.constant 0.000000e+00 : f32
    %54 = vector.broadcast %cst_55 : f32 to vector<16x128xf32>
    %55 = arith.maximumf %53, %54 : vector<16x128xf32>
    %c0_56 = arith.constant 0 : index
    %c0_57 = arith.constant 0 : index
    %c0_58 = arith.constant 0 : index
    %56 = vector.load %arg6[%c0_56, %c0_57, %c0_58] : memref<1x16x128xf32, #tpu.memory_space<vmem>>, vector<1x16x128xf32>
    %57 = vector.shape_cast %56 : vector<1x16x128xf32> to vector<16x128xf32>
    %58 = vector.shape_cast %55 : vector<16x128xf32> to vector<1x16x128xf32>
    tpu.vector_store %arg6[%c0_56, %c0_57, %c0_58], %58 {strides = array<i32>} : memref<1x16x128xf32, #tpu.memory_space<vmem>>, vector<1x16x128xf32>,
    return
  }
  func.func @transform_0(%arg0: i32) -> (i32, i32, i32) {
    %c0_i32 = arith.constant 0 : i32
    %c0_i32_0 = arith.constant 0 : i32
    %c0_i32_1 = arith.constant 0 : i32
    return %arg0, %c0_i32, %c0_i32_0 : i32, i32, i32
  }
  func.func @transform_1(%arg0: i32) -> (i32, i32, i32) {
    %c0_i32 = arith.constant 0 : i32
    %c0_i32_0 = arith.constant 0 : i32
    %c0_i32_1 = arith.constant 0 : i32
    %c0_i32_2 = arith.constant 0 : i32
    return %c0_i32, %c0_i32_0, %c0_i32_1 : i32, i32, i32
  }
  func.func @transform_2(%arg0: i32) -> (i32, i32) {
    %c0_i32 = arith.constant 0 : i32
    %c0_i32_0 = arith.constant 0 : i32
    %c0_i32_1 = arith.constant 0 : i32
    return %c0_i32, %c0_i32_0 : i32, i32
  }
  func.func @transform_3(%arg0: i32) -> (i32, i32, i32) {
    %c0_i32 = arith.constant 0 : i32
    %c0_i32_0 = arith.constant 0 : i32
    %c0_i32_1 = arith.constant 0 : i32
    %c0_i32_2 = arith.constant 0 : i32
    return %c0_i32, %c0_i32_0, %c0_i32_1 : i32, i32, i32
  }
  func.func @transform_4(%arg0: i32) -> (i32, i32) {
    %c0_i32 = arith.constant 0 : i32
    %c0_i32_0 = arith.constant 0 : i32
    %c0_i32_1 = arith.constant 0 : i32
    return %c0_i32, %c0_i32_0 : i32, i32
  }
  func.func @transform_5(%arg0: i32) -> (i32, i32, i32) {
    %c0_i32 = arith.constant 0 : i32
    %c0_i32_0 = arith.constant 0 : i32
    %c0_i32_1 = arith.constant 0 : i32
    return %arg0, %c0_i32, %c0_i32_0 : i32, i32, i32
  }
}

</mosaic_0001>

<bundles_post_ra>
// kernel: tpu_custom_call.1
= control target key start
LH: loop header
LB: loop body
LE: loop exit
PB: predicated region body
PF: predicated region fallthrough
CT: control target
= control target key end

     0   :  { %10 = vsyncpa [#allocation5], 0  ;;  %s1610_s0 = inlined_call_operand.hbm [shape: f32[2,16,128], index: 0, kind: input, shape index: {}]   ;;  %s1611_s1 = inlined_call_operand.hbm [shape: bf16[3,128,128], index: 1, kind: input, shape index: {}]   ;;  %s1612_s2 = inlined_call_operand.vmem [shape: f32[1,128], index: 2, kind: input, shape index: {}]   ;;  %s1613_s3 = inlined_call_operand.hbm [shape: bf16[3,128,128], index: 3, kind: input, shape index: {}]   ;;  %s1614_s4 = inlined_call_operand.vmem [shape: f32[1,128], index: 4, kind: input, shape index: {}]   ;;  %s1615_s5 = inlined_call_operand.hbm [shape: f32[2,16,128], index: 5, kind: output, shape index: {}]  }
   0x1   :  { %12 = vsyncpa [#allocation5 + $0x1], 0 }
   0x2   :  { %13 = vsyncpa [#allocation8], 0 }
   0x3   :  { %14 = vsyncpa [#allocation6], 0 }
   0x4   :  { %16 = vsyncpa [#allocation6 + $0x1], 0  ;;  %s1449_s18 = smov 0   ;;  %s1451_s19 = smov 0  }
   0x5   :  { %s1453_s20 = smov 0   ;;  %s1455_s21 = smov 0  }
   0x6 LB: > { %s1470_s22 = sadd.s32 4294967295, %s1408_s21   ;;  %s912_s23 = sadd.s32 4294967294, %s1408_s21   ;;  %s1408_s21 = sphi %s1455_s21, %s1625_s21   ;;  %s1404_s20 = sphi %s1453_s20, %s1624_s20   ;;  %s1400_s19 = sphi %s1451_s19, %s1623_s19   ;;  %s1396_s18 = sphi %s1449_s18, %s1622_s18  }
   0x7   : > { %p42_p0 = scmp.ne.s32.totalorder %s1400_s19, %s1396_s18  ;;  %p43_p1 = scmp.eq.s32.totalorder %s1470_s22, 0 }
   0x8   : > { %p150_p2 = scmp.eq.s32.totalorder %s1470_s22, 1  ;;  %p156_p3 = scmp.eq.s32.totalorder %s912_s23, 1 }
   0x9   : > { %p1479_p4 = por %p43_p1, %p42_p0  ;;  %p913_p5 = scmp.ge.s32.totalorder %s1408_s21, 1 }
   0xa   : > { %p1484_p6 = por %p156_p3, %p42_p0  ;;  %p163_p7 = scmp.lt.s32.totalorder %s1408_s21, 3 }
   0xb   : > { %s174_s28 = sshll.u32 %s1611_s1, 4  ;;  %s1410_s30 = smov [#allocation7]   ;;  %s175_s28 = int_to_ptr.hbm [resolvable:$true] %s174_s28 }
   0xc   : > { %p1492_p8 = pnand %p913_p5, %p163_p7  ;;  %s176_s6 = sshll.u32 %s1410_s30, 4  ;;  %s177_s6 = int_to_ptr.vmem [resolvable:$true] %s176_s6 }
   0xd   : > { %s191_s9 = sshll.u32 %s1613_s3, 4  ;;  %s1411_s10 = smov 64   ;;  %s192_s9 = int_to_ptr.hbm [resolvable:$true] %s191_s9 }
   0xe   : > { %p1184_p9 = pneg %p1492_p8  ;;  %s1412_s11 = smov 4  }
   0xf   : > { %s1413_s12 = smov [#allocation9]   ;;  %s1505_s14 = sadd.s32 1, %s1408_s21  }
  0x10   : > { %p1185_p10 = pnand %p1184_p9, %p43_p1  ;;  %s193_s13 = sshll.u32 %s1413_s12, 4  ;;  %s194_s13 = int_to_ptr.vmem [resolvable:$true] %s193_s13 }
  0x11   : > { %s29_s15 = sadd.s32 1, %s1404_s20  ;;  %s26_s16 = ssub.s32 %s1408_s21, %s1505_s14 }
  0x12   : > { %1187 = dma.hbm_to_vmem [thread:$0]  (!%p1185_p10), %s175_s28, 3072, %s177_s6, [#allocation8], %s1411_s10, %s1411_s10, %s1412_s11  }
  0x13   : > { %1190 = dma.hbm_to_vmem [thread:$0]  (!%p1185_p10), %s192_s9, 3072, %s194_s13, [#allocation8], %s1411_s10, %s1411_s10, %s1412_s11  }
  0x14   : > { %p36_p12 = scmp.ne.s32.totalorder %s1404_s20, %s1400_s19  ;;  %p27_p13 = scmp.eq.s32.totalorder %s26_s16, 0 }
  0x15   : > { %p37_p0 = scmp.eq.s32.totalorder %s1408_s21, 0  ;;  %p1201_p5 = scmp.lt.s32.totalorder %s1408_s21, 2 }
  0x16   : > { %p1515_p3 = por %p150_p2, %p36_p12  ;;  %s210_s26 = sand.u32 1, %s1404_s20  }
  0x17   : > { %s1521_s23 = scalar_select %p27_p13, %s1404_s20, %s29_s15  }
  0x18   : > { %p38_p7 = por %p37_p0, %p36_p12  ;;  %s917_s27 = sshll.u32 %s210_s26, 4 }
  0x19   : > { %s1122_s28 = sshll.u32 %s1408_s21, 4  ;;  %s214_s8 = scalar_lea.vmem [#allocation4], %s917_s27 }
  0x1a   : > { %s219_s7 = scalar_lea.hbm %s1610_s0, %s1122_s28  ;;  %s222_s9 = sshll.u32 %s214_s8, 4  ;;  %s223_s9 = int_to_ptr.vmem [resolvable:$true] %s222_s9 }
  0x1b   : > { %s220_s10 = sshll.u32 %s219_s7, 4  ;;  %p1528_p2 = pnand %p1201_p5, %p38_p7  ;;  %s221_s10 = int_to_ptr.hbm [resolvable:$true] %s220_s10 }
  0x1c   : > { %s211_s12 = scalar_lea.sflag [#allocation5], %s210_s26  ;;  %s1308_s13 = sshra.s32 %s221_s10, 4  ;;  %s1309_s13 = int_to_ptr.hbm [resolvable:$true] %s1308_s13 }
  0x1d   : > { %s1310_s15 = scalar_lea.hbm %s1309_s13, 16  ;;  %p1312_p10 = pneg %p1528_p2 }
  0x1e   : > { %p1311_p9 = scmp.ne.s32.totalorder %s1309_s13, %s1310_s15  ;;  %s1315_s28 = scalar_lea.hbm %s1610_s0, 32 }
  0x1f   : > { %p1316_p0 = scmp.lt.s32.totalorder %s1309_s13, %s1610_s0  ;;  %p1317_p5 = scmp.lt.s32.totalorder %s1315_s28, %s1310_s15 }
  0x20   : > { %p1313_p12 = pnand %p1312_p10, %p1311_p9 }
  0x21   : > { %p1318_p7 = por %p1317_p5, %p1316_p0 }
  0x22   : > { %p1314_p13 = pneg %p1313_p12 }
  0x24   : > { %p1319_p11 = pnand %p1318_p7, %p1314_p13 }
  0x26   : > { %1322 = shalt.err (!%p1319_p11)
}
  0x27   : > { %s1414_s26 = smov 128   ;;  %s1415_s7 = smov 8  }
  0x28   : > { %1194 = dma.hbm_to_vmem [thread:$0]  (!%p1528_p2), %s221_s10, 256, %s223_s9, %s211_s12, %s1414_s26, %s1414_s26, %s1415_s7  }
  0x29   : > { %234 = sbr.rel (%p1492_p8) target bundleno = 387 (0x183), region = 40  ;;  %s1545_s8 = sand.u32 (!%p1492_p8), 1, %s1400_s19  }
  0x2a   : > { %s921_s13 = sshll.u32 (!%p1492_p8), %s1545_s8, 4  ;;  %s237_s15 = scalar_lea.sflag (!%p1492_p8), [#allocation5], %s1545_s8 }
  0x2b   : > { %s240_s16 = scalar_lea.vmem (!%p1492_p8), [#allocation4], %s921_s13 }
  0x2e   : > { %1383 = dma.done.wait (%p1479_p4), %s237_s15, 256  }
  0x2f   : > { %1385 = vsyncadd (%p1479_p4), %s237_s15, 4294967040 }
  0x30   : > { %1387 = dma.done.wait (%p43_p1), [#allocation8], 6144  }
  0x31   : > { %1389 = vsyncadd (%p43_p1), [#allocation8], 4294961152  ;;  %v1416_v0 = vmov 0.0   ;;  %v1138_v1 = vld [vmem:[#allocation7 + $0x78] sm:$0xff]  ;;  %v1137_v4 = vld [vmem:[#allocation7 + $0x70] sm:$0xff]  ;;  %s1171_s11 = sshll.u32 %s1470_s22, 4 }
  0x32   : > { %278 = vst [vmem:[#allocation2] sm:$0x1] %v1416_v0  ;;  %v1130_v2 = vld [vmem:[#allocation7 + $0x38] sm:$0xff]  ;;  %371 = vmatpush.bf16.msra.mxu0 %v1138_v1  ;;  %v1129_v5 = vld [vmem:[#allocation7 + $0x30] sm:$0xff]  ;;  %v1136_v7 = vld [vmem:[#allocation7 + $0x68] sm:$0xff]  ;;  %s816_s28 = scalar_lea.hbm %s1615_s5, %s1171_s11  ;;  %s277_s30 = scalar_lea.vmem [#allocation10], %s921_s13 }
  0x33   : > { %279 = vst [vmem:[#allocation2 + $0x11] sm:$0x1] %v1416_v0  ;;  %v1146_v3 = vld [vmem:[#allocation7 + $0xb8] sm:$0xff]  ;;  %433 = vmatpush.bf16.msra.mxu1 %v1130_v2  ;;  %v1145_v6 = vld [vmem:[#allocation7 + $0xb0] sm:$0xff]  ;;  %v1128_v8 = vld [vmem:[#allocation7 + $0x28] sm:$0xff]  ;;  %s817_s6 = sshll.u32 %s277_s30, 4  ;;  %s818_s6 = int_to_ptr.vmem [resolvable:$true] %s817_s6 }
  0x34   : > { %539 = vst [vmem:[#allocation3] sm:$0x1] %v1416_v0  ;;  %515 = vmatpush.bf16.msra.mxu2 %v1146_v3  ;;  %v1144_v9 = vld [vmem:[#allocation7 + $0xa8] sm:$0xff]  ;;  %v1559_v10 = vld [vmem:[%s240_s16] sm:$0xff]  ;;  %v1134_v15 = vld [vmem:[#allocation7 + $0x58] sm:$0xff]  ;;  %s819_s26 = sshll.u32 %s816_s28, 4  ;;  %s820_s26 = int_to_ptr.hbm [resolvable:$true] %s819_s26 }
  0x35   : > { %540 = vst [vmem:[#allocation3 + $0x11] sm:$0x1] %v1416_v0  ;;  %v1561_v11 = vld [vmem:[%s240_s16 + $0x8] sm:$0xff]  ;;  %v1135_v12 = vld [vmem:[#allocation7 + $0x60] sm:$0xff]  ;;  %v1133_v18 = vld [vmem:[#allocation7 + $0x50] sm:$0xff]  ;;  %s805_s22 = scalar_lea.sflag [#allocation6], %s1545_s8 }
  0x36   : > { %372 = vmatpush.bf16.msra.mxu0 %v1137_v4  ;;  %282 = vst [vmem:[#allocation2 + $0x1] sm:$0xff] %v1559_v10  ;;  %v1127_v13 = vld [vmem:[#allocation7 + $0x20] sm:$0xff]  ;;  %v1126_v16 = vld [vmem:[#allocation7 + $0x18] sm:$0xff]  ;;  %v1125_v19 = vld [vmem:[#allocation7 + $0x10] sm:$0xff]  ;;  %v305_v31 = vpack.c.bf16 %v1561_v11, %v1559_v10  ;;  %s1352_s7 = sshra.s32 %s820_s26, 4  ;;  %s1358_s24 = scalar_lea.hbm %s1615_s5, 32  ;;  %s1353_s7 = int_to_ptr.hbm [resolvable:$true] %s1352_s7 }
  0x37   : > { %434 = vmatpush.bf16.msra.mxu1 %v1129_v5  ;;  %283 = vst [vmem:[#allocation2 + $0x9] sm:$0xff] %v1561_v11  ;;  %v1143_v14 = vld [vmem:[#allocation7 + $0xa0] sm:$0xff]  ;;  %v1142_v17 = vld [vmem:[#allocation7 + $0x98] sm:$0xff]  ;;  %v1141_v20 = vld [vmem:[#allocation7 + $0x90] sm:$0xff]  ;;  %s1354_s15 = scalar_lea.hbm %s1353_s7, 16  ;;  %p1359_p11 = scmp.lt.s32.totalorder %s1353_s7, %s1615_s5 }
  0x38   : > { %516 = vmatpush.bf16.msra.mxu2 %v1145_v6  ;;  %v1132_v21 = vld [vmem:[#allocation7 + $0x48] sm:$0xff]  ;;  %v1131_v24 = vld [vmem:[#allocation7 + $0x40] sm:$0xff]  ;;  %v1162_v34 = vld [vmem:[#allocation9 + $0x78] sm:$0xff]  ;;  %p1355_p1 = scmp.ne.s32.totalorder %s1353_s7, %s1354_s15  ;;  %p1360_p2 = scmp.lt.s32.totalorder %s1358_s24, %s1354_s15 }
  0x39   : > { %v1124_v22 = vld [vmem:[#allocation7 + $0x8] sm:$0xff]  ;;  %v1123_v25 = vld [vmem:[#allocation7] sm:$0xff]  ;;  %630 = vmatpush.bf16.msra.mxu3 %v1162_v34  ;;  %v1161_v35 = vld [vmem:[#allocation9 + $0x70] sm:$0xff] }
  0x3a   : > { %373 = vmatpush.bf16.msra.mxu0 %v1136_v7  ;;  %v1140_v23 = vld [vmem:[#allocation7 + $0x88] sm:$0xff]  ;;  %v1139_v28 = vld [vmem:[#allocation7 + $0x80] sm:$0xff]  ;;  %v1154_v36 = vld [vmem:[#allocation9 + $0x38] sm:$0xff]  ;;  %p1356_p4 = pnand %p1355_p1, %p1515_p3  ;;  %p1361_p9 = por %p1360_p2, %p1359_p11 }
  0x3b   : > { %435 = vmatpush.bf16.msra.mxu1 %v1128_v8  ;;  %v1170_v37 = vld [vmem:[#allocation9 + $0xb8] sm:$0xff]  ;;  %v1160_v38 = vld [vmem:[#allocation9 + $0x68] sm:$0xff]  ;;  %v1153_v39 = vld [vmem:[#allocation9 + $0x30] sm:$0xff] }
  0x3c   : > { %517 = vmatpush.bf16.msra.mxu2 %v1144_v9  ;;  %v1169_v40 = vld [vmem:[#allocation9 + $0xb0] sm:$0xff]  ;;  %v1159_v41 = vld [vmem:[#allocation9 + $0x60] sm:$0xff]  ;;  %v1152_v42 = vld [vmem:[#allocation9 + $0x28] sm:$0xff]  ;;  %p1357_p8 = pneg %p1356_p4 }
  0x3d   : > { %v284_v26 = vld [vmem:[#allocation2] sm:$0xff]  ;;  %631 = vmatpush.bf16.msra.mxu3 %v1161_v35  ;;  %v1168_v43 = vld [vmem:[#allocation9 + $0xa8] sm:$0xff]  ;;  %v1158_v44 = vld [vmem:[#allocation9 + $0x58] sm:$0xff] }
  0x3e   : > { %374 = vmatpush.bf16.msra.mxu0 %v1135_v12  ;;  %v285_v27 = vld [vmem:[#allocation2 + $0x8] sm:$0xff]  ;;  %v1151_v45 = vld [vmem:[#allocation9 + $0x20] sm:$0xff]  ;;  %v1157_v47 = vld [vmem:[#allocation9 + $0x50] sm:$0xff]  ;;  %p1362_p10 = pnand %p1361_p9, %p1357_p8 }
  0x3f   : > { %436 = vmatpush.bf16.msra.mxu1 %v1127_v13  ;;  %v447_v29 = vld [vmem:[#allocation2 + $0x2] sm:$0xff]  ;;  %v448_v30 = vld [vmem:[#allocation2 + $0xa] sm:$0xff]  ;;  %v286_v32 = vpack.c.bf16 %v285_v27, %v284_v26  ;;  %v1156_v50 = vld [vmem:[#allocation9 + $0x48] sm:$0xff] }
  0x40   : > { %518 = vmatpush.bf16.msra.mxu2 %v1143_v14  ;;  %v449_v33 = vpack.c.bf16 %v448_v30, %v447_v29  ;;  %v1167_v46 = vld [vmem:[#allocation9 + $0xa0] sm:$0xff]  ;;  %v1150_v48 = vld [vmem:[#allocation9 + $0x18] sm:$0xff]  ;;  %v1149_v51 = vld [vmem:[#allocation9 + $0x10] sm:$0xff] }
  0x41   : > { %632 = vmatpush.bf16.msra.mxu3 %v1160_v38  ;;  %v1166_v49 = vld [vmem:[#allocation9 + $0x98] sm:$0xff]  ;;  %v1165_v52 = vld [vmem:[#allocation9 + $0x90] sm:$0xff]  ;;  %v1155_v53 = vld [vmem:[#allocation9 + $0x40] sm:$0xff] }
  0x42   : > { %375 = vmatpush.bf16.msra.mxu0 %v1134_v15  ;;  %v1148_v54 = vld [vmem:[#allocation9 + $0x8] sm:$0xff]  ;;  %v1147_v56 = vld [vmem:[#allocation9] sm:$0xff]  ;;  %v1246_v61 = vld [vmem:[%s1612_s2] ss:$0 sm:$0xff] }
  0x43   : > { %437 = vmatpush.bf16.msra.mxu1 %v1126_v16  ;;  %v1164_v55 = vld [vmem:[#allocation9 + $0x88] sm:$0xff]  ;;  %v1163_v57 = vld [vmem:[#allocation9 + $0x80] sm:$0xff] }
  0x44   : > { %519 = vmatpush.bf16.msra.mxu2 %v1142_v17 }
  0x45   : > { %633 = vmatpush.bf16.msra.mxu3 %v1159_v41 }
  0x46   : > { %376 = vmatpush.bf16.msra.mxu0 %v1133_v18 }
  0x47   : > { %438 = vmatpush.bf16.msra.mxu1 %v1125_v19 }
  0x48   : > { %520 = vmatpush.bf16.msra.mxu2 %v1141_v20 }
  0x49   : > { %634 = vmatpush.bf16.msra.mxu3 %v1158_v44 }
  0x4a   : > { %377 = vmatpush.bf16.msra.mxu0 %v1132_v21 }
  0x4b   : > { %439 = vmatpush.bf16.msra.mxu1 %v1124_v22  ;;  %v1247_v22 = vld [vmem:[%s1614_s4] ss:$0 sm:$0xff] }
  0x4c   : > { %521 = vmatpush.bf16.msra.mxu2 %v1140_v23 }
  0x4d   : > { %635 = vmatpush.bf16.msra.mxu3 %v1157_v47 }
  0x4e   : > { %378 = vmatpush.bf16.msra.mxu0 %v1131_v24 }
  0x4f   : > { %440 = vmatpush.bf16.msra.mxu1 %v1123_v25 }
  0x50   : > { %522 = vmatpush.bf16.msra.mxu2 %v1139_v28 }
  0x51   : > { %379 = vmatmul.bf16.vlgmr.msra.gmra.mxu0 %v305_v31  ;;  %636 = vmatpush.bf16.msra.mxu3 %v1156_v50 }
  0x52   : > { %441 = vmatmul.bf16.vlgmr.msra.gmra.mxu1 %v286_v32  ;;  %692 = vmatpush.bf16.msrb.mxu0 %v1154_v36 }
  0x53   : > { %523 = vmatmul.bf16.vlgmr.msra.gmra.mxu2 %v449_v33  ;;  %774 = vmatpush.bf16.msrb.mxu1 %v1170_v37 }
  0x55   : > { %637 = vmatpush.bf16.msra.mxu3 %v1155_v53 }
  0x56   : > { %693 = vmatpush.bf16.msrb.mxu0 %v1153_v39 }
  0x57   : > { %775 = vmatpush.bf16.msrb.mxu1 %v1169_v40 }
  0x5a   : > { %694 = vmatpush.bf16.msrb.mxu0 %v1152_v42 }
  0x5b   : > { %776 = vmatpush.bf16.msrb.mxu1 %v1168_v43 }
  0x5e   : > { %695 = vmatpush.bf16.msrb.mxu0 %v1151_v45 }
  0x5f   : > { %777 = vmatpush.bf16.msrb.mxu1 %v1167_v46 }
  0x62   : > { %696 = vmatpush.bf16.msrb.mxu0 %v1150_v48 }
  0x63   : > { %778 = vmatpush.bf16.msrb.mxu1 %v1166_v49 }
  0x66   : > { %697 = vmatpush.bf16.msrb.mxu0 %v1149_v51 }
  0x67   : > { %779 = vmatpush.bf16.msrb.mxu1 %v1165_v52 }
  0x6a   : > { %698 = vmatpush.bf16.msrb.mxu0 %v1148_v54 }
  0x6b   : > { %780 = vmatpush.bf16.msrb.mxu1 %v1164_v55 }
  0x6e   : > { %699 = vmatpush.bf16.msrb.mxu0 %v1147_v56 }
  0x6f   : > { %781 = vmatpush.bf16.msrb.mxu1 %v1163_v57 }
  0xce   : > { %v380_v58 = vpop.f32.mrf.mxu0 }
  0xcf   : > { %v442_v59 = vpop.f32.mrf.mxu1 }
  0xd0   : > { %v443_v60 = vadd.f32 %v442_v59, %v380_v58 }
  0xd6   : > { %v524_v62 = vpop.f32.mrf.mxu2  ;;  %v382_v1 = vpop.f32.mrf.mxu0 }
  0xd7   : > { %v529_v63 = vadd.f32 %v524_v62, %v443_v60  ;;  %v444_v2 = vpop.f32.mrf.mxu1 }
  0xd8   : > { %v445_v4 = vadd.f32 %v444_v2, %v382_v1 }
  0xd9   : > { %v535_v0 = vadd.f32 %v1246_v61, %v529_v63 }
  0xdb   : > { %v537_v3 = vmax.f32 %v535_v0, 0.0 }
  0xdd   : > { %541 = vst [vmem:[#allocation3 + $0x1] sm:$0xff] %v537_v3 }
  0xde   : > { %v526_v5 = vpop.f32.mrf.mxu2 }
  0xdf   : > { %v530_v6 = vadd.f32 %v526_v5, %v445_v4 }
  0xe1   : > { %v536_v7 = vadd.f32 %v1246_v61, %v530_v6 }
  0xe3   : > { %v538_v8 = vmax.f32 %v536_v7, 0.0 }
  0xe4   : > { %v543_v12 = vld [vmem:[#allocation3] sm:$0xff] }
  0xe5   : > { %542 = vst [vmem:[#allocation3 + $0x9] sm:$0xff] %v538_v8  ;;  %v564_v9 = vpack.c.bf16 %v538_v8, %v537_v3 }
  0xe7   : > { %638 = vmatmul.bf16.vlgmr.msra.gmra.mxu3 %v564_v9 }
  0xec   : > { %v544_v13 = vld [vmem:[#allocation3 + $0x8] sm:$0xff] }
  0xed   : > { %v706_v14 = vld [vmem:[#allocation3 + $0x2] sm:$0xff]  ;;  %v707_v15 = vld [vmem:[#allocation3 + $0xa] sm:$0xff]  ;;  %v545_v16 = vpack.c.bf16 %v544_v13, %v543_v12 }
  0xee   : > { %v708_v17 = vpack.c.bf16 %v707_v15, %v706_v14 }
  0xef   : > { %700 = vmatmul.bf16.vlgmr.msrb.gmra.mxu0 %v545_v16 }
  0xf0   : > { %782 = vmatmul.bf16.vlgmr.msrb.gmra.mxu1 %v708_v17 }
 0x16a   : > { %v639_v18 = vpop.f32.mrf.mxu3 }
 0x16c   : > { %v701_v19 = vpop.f32.mrf.mxu0 }
 0x16d   : > { %v783_v20 = vpop.f32.mrf.mxu1  ;;  %v702_v21 = vadd.f32 %v701_v19, %v639_v18 }
 0x16f   : > { %v788_v23 = vadd.f32 %v783_v20, %v702_v21 }
 0x171   : > { %v794_v24 = vadd.f32 %v1247_v22, %v788_v23 }
 0x172   : > { %v641_v27 = vpop.f32.mrf.mxu3 }
 0x173   : > { %v798_v25 = vadd.f32 %v794_v24, %v1559_v10 }
 0x174   : > { %v703_v26 = vpop.f32.mrf.mxu0 }
 0x175   : > { %v800_v28 = vmax.f32 %v798_v25, 0.0  ;;  %v704_v29 = vadd.f32 %v703_v26, %v641_v27  ;;  %v785_v30 = vpop.f32.mrf.mxu1 }
 0x177   : > { %802 = vst [vmem:[%s277_s30] sm:$0xff] %v800_v28  ;;  %v789_v31 = vadd.f32 %v785_v30, %v704_v29 }
 0x179   : > { %v795_v32 = vadd.f32 %v1247_v22, %v789_v31 }
 0x17b   : > { %v799_v10 = vadd.f32 %v795_v32, %v1561_v11 }
 0x17d   : > { %v801_v33 = vmax.f32 %v799_v10, 0.0 }
 0x17f   : > { %803 = vst [vmem:[%s277_s30 + $0x8] sm:$0xff] %v801_v33 }
 0x180   : > { %1365 = shalt.err (!%p1362_p10)
}
 0x181   : > { %s1417_s8 = smov 128   ;;  %s1418_s10 = smov 8  }
 0x182   : > { %1182 = dma.vmem_to_hbm [thread:$0]  (%p1515_p3), %s818_s6, 256, %s820_s26, %s805_s22, %s1417_s8, %s1417_s8, %s1418_s10  }
 0x183 PF: > { %s834_s11 = sand.u32 1, %s1396_s18   ;;  %p1621_p12 = scmp.ge.s32.totalorder %s1408_s21, 2 }
 0x184   : > { %s835_s12 = scalar_lea.sflag [#allocation6], %s834_s11 }
 0x185   : > { %p1196_p13 = pnand %p1621_p12, %p1484_p6 }
 0x187   : > { %p1197_p0 = pneg %p1196_p13 }
 0x189   : > { %1391 = dma.done.wait (%p1197_p0), %s835_s12, 256  }
 0x18a   : > { %1393 = vsyncadd (%p1197_p0), %s835_s12, 4294967040  ;;  %p19_p5 = scmp.ge.s32.totalorder %s1505_s14, 4   ;;  %s1622_s18 = smov %s1400_s19 }
 0x18b   : > { %s1623_s19 = smov %s1404_s20  ;;  %s1624_s20 = smov %s1521_s23 }
 0x18c   : > { %s1625_s21 = smov %s1505_s14  ;;  %21 = sbr.rel (!%p19_p5) target bundleno = 6 (0x6), region = 97 }
 0x191   :  { %841 = vsyncpa [#allocation5], 1 }
 0x192   :  { %843 = vsyncpa [#allocation5 + $0x1], 1 }
 0x193   :  { %844 = vsyncpa [#allocation8], 1 }
 0x194   :  { %845 = vsyncpa [#allocation6], 1 }
 0x195   :  { %847 = vsyncpa [#allocation6 + $0x1], 1 }

</bundles_post_ra>
